<compile_context>
chip_gen: v5e
topology: v5e:2x2
jax: 0.10.0
libtpu: 0.0.40
codegen_flags: <defaults>
</compile_context>

<pallas_src>
import functools
import random

import numpy as np
import jax
import jax.numpy as jnp
from jax.experimental import pallas as pl
from jax.experimental.pallas import tpu as pltpu


def maxpool_agg_kernel(x_ref, w_ref, b_ref, cnt_ref, o_ref, *, negative_slope):
    # x_ref : (S, tb, D) slot-major neighbor activations (f32 or bf16)
    # w_ref : (D, D) pooling weights, b_ref: (1, D) bias, cnt_ref: (tb, 1) int32
    # o_ref : (tb, D) max-pooled output
    S = x_ref.shape[0]
    w = w_ref[...].astype(jnp.bfloat16)          # cast params in-kernel (tiny)
    b = b_ref[...]                               # (1, D) f32
    cnt = cnt_ref[...]                           # (tb, 1) int32 neighbor counts

    acc = None
    # S = num_sample + 1 is small (11); static unroll keeps everything
    # reshape-free.  For very large S switch to lax.fori_loop.
    for s in range(S):
        x = x_ref[s].astype(jnp.bfloat16)        # (tb, D); first-axis index, cheap
        h = jnp.dot(x, w, preferred_element_type=jnp.float32) + b
        h = jnp.where(h >= 0, h, negative_slope * h)     # leaky_relu (slope 0.01)
        # Prefix mask: slots s >= count contribute exactly 0, same as h*mask.
        h = jnp.where(s < cnt, h, 0.0)
        acc = h if acc is None else jnp.maximum(acc, h)
    o_ref[...] = acc.astype(o_ref.dtype)


def _vmem_capacity_bytes():
    try:
        return int(pltpu.get_tpu_info().vmem_capacity_bytes)
    except Exception:
        return 64 << 20          # v7x per-core VMEM; conservative fallback


def _choose_tb(B, S, D, x_itemsize, vmem_budget):
    """Largest batch tile that fits the (generation-aware) VMEM budget,
    preferring >= 4 grid steps (2 per TensorCore on v7x), then >= 2, then 1."""
    lane = 128 * pl.cdiv(D, 128)                       # lane-padded width in VMEM
    sub_align = max(8, 32 // max(1, x_itemsize))       # 8 (f32) / 16 (bf16) / 32 (i8)

    # Tile-size independent VMEM: W and bias double buffers (f32, padded).
    const = 2 * (pl.cdiv(D, 8) * 8) * lane * 4 + 2 * 8 * lane * 4
    budget = max(vmem_budget - const, 1 << 20)

    def cost(tb):
        c = 2 * S * tb * lane * x_itemsize     # x block, double buffered, lane padded
        c += 2 * tb * 128 * 4                  # counts (tb, 1) int32 block
        c += 2 * tb * lane * 4                 # output block
        c += 4 * tb * lane * 4                 # live f32 intermediates (h, acc, ...)
        return c

    cands = [t for t in range(sub_align, B + 1, sub_align) if B % t == 0]
    if B not in cands:
        cands.append(B)                        # full-batch block is always layout-legal
    fitting = [t for t in cands if cost(t) <= budget] or [min(cands)]
    for min_steps in (4, 2, 1):                # 4 steps -> 2 per TC on v7x
        ok = [t for t in fitting if B // t >= min_steps]
        if ok:
            return max(ok)
    return max(fitting)


def maxpool_aggregate(neigh_sm, w_pool, bias, counts, *, tb=None,
                      negative_slope=0.01, out_dtype=jnp.float32):
    """GraphSAGE max-pool aggregation.

    neigh_sm : (S, B, D) slot-major neighbor activations (f32 or bf16).  Gather
               upstream directly in this order (embed[idx.T]) so no transpose /
               cast / pad pass over the big tensor is needed.
    counts   : (B,) int32 number of valid neighbors per node.  Assumes the
               module's prefix-shaped mask (mask[i, :counts[i]] = 1).
    Returns  : (B, D) = max_s( leaky_relu(x_s @ W + b) * mask_s )
    """
    S, B, D = neigh_sm.shape
    assert w_pool.shape == (D, D) and bias.shape[-1] == D
    cnt = counts.reshape(B, 1).astype(jnp.int32)
    b2 = bias.reshape(1, D).astype(jnp.float32)

    vmem_cap = _vmem_capacity_bytes()
    if tb is None:
        tb = _choose_tb(B, S, D, jnp.dtype(neigh_sm.dtype).itemsize, vmem_cap // 4)
    assert B % tb == 0
    grid = (B // tb,)

    kernel = functools.partial(maxpool_agg_kernel, negative_slope=negative_slope)
    return pl.pallas_call(
        kernel,
        out_shape=jax.ShapeDtypeStruct((B, D), out_dtype),
        grid_spec=pl.GridSpec(
            grid=grid,
            in_specs=[
                pl.BlockSpec((S, tb, D), lambda i: (0, i, 0)),   # x, slot-major
                pl.BlockSpec((D, D), lambda i: (0, 0)),          # W_pool
                pl.BlockSpec((1, D), lambda i: (0, 0)),          # bias
                pl.BlockSpec((tb, 1), lambda i: (i, 0)),         # neighbor counts
            ],
            out_specs=pl.BlockSpec((tb, D), lambda i: (i, 0)),
        ),
        compiler_params=pltpu.CompilerParams(
            dimension_semantics=("parallel",),
            vmem_limit_bytes=int(vmem_cap // 2),
        ),
    )(neigh_sm, w_pool, b2, cnt)


if __name__ == "__main__":
    # ------------------------------------------------------------------
    # Deterministic synthetic setup (mirrors MaxPoolAggregator.__init__).
    # ------------------------------------------------------------------
    random.seed(0)
    key = jax.random.PRNGKey(0)
    k_feat, k_w, k_b = jax.random.split(key, 3)

    N = 64            # total nodes in the synthetic graph
    D = 32            # input_dim
    B = 32            # nodes in the batch
    num_sample = 10
    S = num_sample + 1

    feat_table = jax.random.normal(k_feat, (N, D), dtype=jnp.float32)
    limit = float(np.sqrt(6.0 / (D + D)))
    W_pool = jax.random.uniform(k_w, (D, D), minval=-limit, maxval=limit,
                                dtype=jnp.float32)
    b = jax.random.uniform(k_b, (D,), minval=-0.1, maxval=0.1, dtype=jnp.float32)

    nodes = list(range(B))
    graph_rng = random.Random(0)
    to_neighs = [set(graph_rng.sample(range(N), graph_rng.randint(3, 15)))
                 for _ in range(B)]

    # ------------------------------------------------------------------
    # Glue reproducing MaxPoolAggregator.forward (sampling + gather).
    # TODO(synk): Python set-based neighbor sampling / unique-node dict remap
    # is host-side control flow with no clean in-kernel equivalent.
    # ------------------------------------------------------------------
    _sample = random.sample
    samp_neighs = [
        _sample(sorted(tn), num_sample) if len(tn) >= num_sample else sorted(tn)
        for tn in to_neighs
    ]
    counts_np = np.array([len(sn) for sn in samp_neighs], dtype=np.int32)  # mask row sums
    samp_neighs = [
        sn + [nodes[i] for _ in range(num_sample - len(sn) + 1)]
        for i, sn in enumerate(samp_neighs)
    ]

    unique_nodes_list = list(set(n for neigh in samp_neighs for n in neigh))
    unique_nodes = {n: i for i, n in enumerate(unique_nodes_list)}
    embed_matrix = feat_table[jnp.asarray(unique_nodes_list, dtype=jnp.int32)]

    idx = np.array([[unique_nodes[n] for n in sn] for sn in samp_neighs],
                   dtype=np.int32)                            # (B, S)

    # Gather the neighbor activations slot-major and bf16 "at rest": the gather
    # itself emits the kernel-friendly layout, so there is no extra cast / pad /
    # transpose pass over the big tensor before the kernel.
    neigh_sm = embed_matrix.astype(jnp.bfloat16)[jnp.asarray(idx.T)]   # (S, B, D)
    counts = jnp.asarray(counts_np)                                    # (B,)

    # ------------------------------------------------------------------
    # Run the Pallas kernel and check against a plain-JAX f32 reference.
    # ------------------------------------------------------------------
    out = maxpool_aggregate(neigh_sm, W_pool, b, counts)
    out = jax.block_until_ready(out)

    neigh_ref = embed_matrix[jnp.asarray(idx)]                         # (B, S, D) f32
    mask = (np.arange(S)[None, :] < counts_np[:, None]).astype(np.float32)
    ref_h = jnp.einsum("bsd,de->bse", neigh_ref, W_pool) + b
    ref_h = jnp.where(ref_h >= 0, ref_h, 0.01 * ref_h)
    ref = jnp.max(ref_h * jnp.asarray(mask)[:, :, None], axis=1)

    assert out.shape == (B, D)
    # bf16 activations/weights -> relaxed tolerance vs the f32 reference
    # (intentional precision choice for the GraphSAGE aggregator).
    np.testing.assert_allclose(np.asarray(out), np.asarray(ref),
                               rtol=5e-2, atol=5e-2)

    print("KERNEL_OK")
</pallas_src>

<mosaic_0001>
module attributes {stable_mosaic.version = 11 : i64} {
  func.func @maxpool_agg_kernel(%arg0: i32, %arg1: memref<11x16x32xbf16, #tpu.memory_space<vmem>>, %arg2: memref<32x32xf32, #tpu.memory_space<vmem>>, %arg3: memref<1x32xf32, #tpu.memory_space<vmem>>, %arg4: memref<16x1xi32, #tpu.memory_space<vmem>>, %arg5: memref<16x32xf32, #tpu.memory_space<vmem>>) attributes {dimension_semantics = [#tpu.dimension_semantics<parallel>], iteration_bounds = array<i64: 2>, scalar_prefetch = 0 : i64, scratch_operands = 0 : i64, tpu.core_type = #tpu.core_type<tc>, window_params = [{transform_indices = @transform_0, window_bounds = array<i64: 11, 16, 32>}, {pipeline_mode = #tpu.pipeline_mode<synchronous>, transform_indices = @transform_1, window_bounds = array<i64: 32, 32>}, {pipeline_mode = #tpu.pipeline_mode<synchronous>, transform_indices = @transform_2, window_bounds = array<i64: 1, 32>}, {transform_indices = @transform_3, window_bounds = array<i64: 16, 1>}, {transform_indices = @transform_4, window_bounds = array<i64: 16, 32>}]} {
    %c0 = arith.constant 0 : index
    %c0_0 = arith.constant 0 : index
    %0 = vector.load %arg2[%c0, %c0_0] : memref<32x32xf32, #tpu.memory_space<vmem>>, vector<32x32xf32>
    %1 = arith.truncf %0 : vector<32x32xf32> to vector<32x32xbf16>
    %c0_1 = arith.constant 0 : index
    %c0_2 = arith.constant 0 : index
    %2 = vector.load %arg3[%c0_1, %c0_2] : memref<1x32xf32, #tpu.memory_space<vmem>>, vector<1x32xf32>
    %c0_3 = arith.constant 0 : index
    %c0_4 = arith.constant 0 : index
    %3 = vector.load %arg4[%c0_3, %c0_4] : memref<16x1xi32, #tpu.memory_space<vmem>>, vector<16x1xi32>
    %c0_5 = arith.constant 0 : index
    %c0_6 = arith.constant 0 : index
    %c0_7 = arith.constant 0 : index
    %4 = vector.load %arg1[%c0_5, %c0_6, %c0_7] : memref<11x16x32xbf16, #tpu.memory_space<vmem>>, vector<1x16x32xbf16>
    %5 = vector.shape_cast %4 : vector<1x16x32xbf16> to vector<16x32xbf16>
    %cst = arith.constant dense<0.000000e+00> : vector<16x32xf32>
    %6 = tpu.matmul %5, %1, %cst {dimension_numbers = #tpu.dot_dimension_numbers<[1], [0], [0], [1], [0, 0, 1, 1], [], []>} : vector<16x32xbf16>, vector<32x32xbf16>, vector<16x32xf32> -> vector<16x32xf32>
    %7 = vector.broadcast %2 : vector<1x32xf32> to vector<16x32xf32>
    %8 = arith.addf %6, %7 : vector<16x32xf32>
    %cst_8 = arith.constant 0.000000e+00 : f32
    %9 = vector.broadcast %cst_8 : f32 to vector<16x32xf32>
    %10 = arith.cmpf oge, %8, %9 : vector<16x32xf32>
    %cst_9 = arith.constant 0.00999999977 : f32
    %11 = vector.broadcast %cst_9 : f32 to vector<16x32xf32>
    %12 = arith.mulf %11, %8 : vector<16x32xf32>
    %13 = arith.select %10, %8, %12 : vector<16x32xi1>, vector<16x32xf32>
    %c0_i32 = arith.constant 0 : i32
    %14 = vector.broadcast %c0_i32 : i32 to vector<16x1xi32>
    %15 = arith.cmpi sgt, %3, %14 : vector<16x1xi32>
    %cst_10 = arith.constant 0.000000e+00 : f32
    %16 = vector.shape_cast %15 : vector<16x1xi1> to vector<16x1xi1>
    %17 = vector.broadcast %16 : vector<16x1xi1> to vector<16x32xi1>
    %18 = vector.broadcast %cst_10 : f32 to vector<16x32xf32>
    %19 = arith.select %17, %13, %18 : vector<16x32xi1>, vector<16x32xf32>
    %c1 = arith.constant 1 : index
    %c0_11 = arith.constant 0 : index
    %c0_12 = arith.constant 0 : index
    %20 = vector.load %arg1[%c1, %c0_11, %c0_12] : memref<11x16x32xbf16, #tpu.memory_space<vmem>>, vector<1x16x32xbf16>
    %21 = vector.shape_cast %20 : vector<1x16x32xbf16> to vector<16x32xbf16>
    %cst_13 = arith.constant dense<0.000000e+00> : vector<16x32xf32>
    %22 = tpu.matmul %21, %1, %cst_13 {dimension_numbers = #tpu.dot_dimension_numbers<[1], [0], [0], [1], [0, 0, 1, 1], [], []>} : vector<16x32xbf16>, vector<32x32xbf16>, vector<16x32xf32> -> vector<16x32xf32>
    %23 = vector.broadcast %2 : vector<1x32xf32> to vector<16x32xf32>
    %24 = arith.addf %22, %23 : vector<16x32xf32>
    %cst_14 = arith.constant 0.000000e+00 : f32
    %25 = vector.broadcast %cst_14 : f32 to vector<16x32xf32>
    %26 = arith.cmpf oge, %24, %25 : vector<16x32xf32>
    %cst_15 = arith.constant 0.00999999977 : f32
    %27 = vector.broadcast %cst_15 : f32 to vector<16x32xf32>
    %28 = arith.mulf %27, %24 : vector<16x32xf32>
    %29 = arith.select %26, %24, %28 : vector<16x32xi1>, vector<16x32xf32>
    %c1_i32 = arith.constant 1 : i32
    %30 = vector.broadcast %c1_i32 : i32 to vector<16x1xi32>
    %31 = arith.cmpi sgt, %3, %30 : vector<16x1xi32>
    %cst_16 = arith.constant 0.000000e+00 : f32
    %32 = vector.shape_cast %31 : vector<16x1xi1> to vector<16x1xi1>
    %33 = vector.broadcast %32 : vector<16x1xi1> to vector<16x32xi1>
    %34 = vector.broadcast %cst_16 : f32 to vector<16x32xf32>
    %35 = arith.select %33, %29, %34 : vector<16x32xi1>, vector<16x32xf32>
    %36 = arith.maximumf %19, %35 : vector<16x32xf32>
    %c2 = arith.constant 2 : index
    %c0_17 = arith.constant 0 : index
    %c0_18 = arith.constant 0 : index
    %37 = vector.load %arg1[%c2, %c0_17, %c0_18] : memref<11x16x32xbf16, #tpu.memory_space<vmem>>, vector<1x16x32xbf16>
    %38 = vector.shape_cast %37 : vector<1x16x32xbf16> to vector<16x32xbf16>
    %cst_19 = arith.constant dense<0.000000e+00> : vector<16x32xf32>
    %39 = tpu.matmul %38, %1, %cst_19 {dimension_numbers = #tpu.dot_dimension_numbers<[1], [0], [0], [1], [0, 0, 1, 1], [], []>} : vector<16x32xbf16>, vector<32x32xbf16>, vector<16x32xf32> -> vector<16x32xf32>
    %40 = vector.broadcast %2 : vector<1x32xf32> to vector<16x32xf32>
    %41 = arith.addf %39, %40 : vector<16x32xf32>
    %cst_20 = arith.constant 0.000000e+00 : f32
    %42 = vector.broadcast %cst_20 : f32 to vector<16x32xf32>
    %43 = arith.cmpf oge, %41, %42 : vector<16x32xf32>
    %cst_21 = arith.constant 0.00999999977 : f32
    %44 = vector.broadcast %cst_21 : f32 to vector<16x32xf32>
    %45 = arith.mulf %44, %41 : vector<16x32xf32>
    %46 = arith.select %43, %41, %45 : vector<16x32xi1>, vector<16x32xf32>
    %c2_i32 = arith.constant 2 : i32
    %47 = vector.broadcast %c2_i32 : i32 to vector<16x1xi32>
    %48 = arith.cmpi sgt, %3, %47 : vector<16x1xi32>
    %cst_22 = arith.constant 0.000000e+00 : f32
    %49 = vector.shape_cast %48 : vector<16x1xi1> to vector<16x1xi1>
    %50 = vector.broadcast %49 : vector<16x1xi1> to vector<16x32xi1>
    %51 = vector.broadcast %cst_22 : f32 to vector<16x32xf32>
    %52 = arith.select %50, %46, %51 : vector<16x32xi1>, vector<16x32xf32>
    %53 = arith.maximumf %36, %52 : vector<16x32xf32>
    %c3 = arith.constant 3 : index
    %c0_23 = arith.constant 0 : index
    %c0_24 = arith.constant 0 : index
    %54 = vector.load %arg1[%c3, %c0_23, %c0_24] : memref<11x16x32xbf16, #tpu.memory_space<vmem>>, vector<1x16x32xbf16>
    %55 = vector.shape_cast %54 : vector<1x16x32xbf16> to vector<16x32xbf16>
    %cst_25 = arith.constant dense<0.000000e+00> : vector<16x32xf32>
    %56 = tpu.matmul %55, %1, %cst_25 {dimension_numbers = #tpu.dot_dimension_numbers<[1], [0], [0], [1], [0, 0, 1, 1], [], []>} : vector<16x32xbf16>, vector<32x32xbf16>, vector<16x32xf32> -> vector<16x32xf32>
    %57 = vector.broadcast %2 : vector<1x32xf32> to vector<16x32xf32>
    %58 = arith.addf %56, %57 : vector<16x32xf32>
    %cst_26 = arith.constant 0.000000e+00 : f32
    %59 = vector.broadcast %cst_26 : f32 to vector<16x32xf32>
    %60 = arith.cmpf oge, %58, %59 : vector<16x32xf32>
    %cst_27 = arith.constant 0.00999999977 : f32
    %61 = vector.broadcast %cst_27 : f32 to vector<16x32xf32>
    %62 = arith.mulf %61, %58 : vector<16x32xf32>
    %63 = arith.select %60, %58, %62 : vector<16x32xi1>, vector<16x32xf32>
    %c3_i32 = arith.constant 3 : i32
    %64 = vector.broadcast %c3_i32 : i32 to vector<16x1xi32>
    %65 = arith.cmpi sgt, %3, %64 : vector<16x1xi32>
    %cst_28 = arith.constant 0.000000e+00 : f32
    %66 = vector.shape_cast %65 : vector<16x1xi1> to vector<16x1xi1>
    %67 = vector.broadcast %66 : vector<16x1xi1> to vector<16x32xi1>
    %68 = vector.broadcast %cst_28 : f32 to vector<16x32xf32>
    %69 = arith.select %67, %63, %68 : vector<16x32xi1>, vector<16x32xf32>
    %70 = arith.maximumf %53, %69 : vector<16x32xf32>
    %c4 = arith.constant 4 : index
    %c0_29 = arith.constant 0 : index
    %c0_30 = arith.constant 0 : index
    %71 = vector.load %arg1[%c4, %c0_29, %c0_30] : memref<11x16x32xbf16, #tpu.memory_space<vmem>>, vector<1x16x32xbf16>
    %72 = vector.shape_cast %71 : vector<1x16x32xbf16> to vector<16x32xbf16>
    %cst_31 = arith.constant dense<0.000000e+00> : vector<16x32xf32>
    %73 = tpu.matmul %72, %1, %cst_31 {dimension_numbers = #tpu.dot_dimension_numbers<[1], [0], [0], [1], [0, 0, 1, 1], [], []>} : vector<16x32xbf16>, vector<32x32xbf16>, vector<16x32xf32> -> vector<16x32xf32>
    %74 = vector.broadcast %2 : vector<1x32xf32> to vector<16x32xf32>
    %75 = arith.addf %73, %74 : vector<16x32xf32>
    %cst_32 = arith.constant 0.000000e+00 : f32
    %76 = vector.broadcast %cst_32 : f32 to vector<16x32xf32>
    %77 = arith.cmpf oge, %75, %76 : vector<16x32xf32>
    %cst_33 = arith.constant 0.00999999977 : f32
    %78 = vector.broadcast %cst_33 : f32 to vector<16x32xf32>
    %79 = arith.mulf %78, %75 : vector<16x32xf32>
    %80 = arith.select %77, %75, %79 : vector<16x32xi1>, vector<16x32xf32>
    %c4_i32 = arith.constant 4 : i32
    %81 = vector.broadcast %c4_i32 : i32 to vector<16x1xi32>
    %82 = arith.cmpi sgt, %3, %81 : vector<16x1xi32>
    %cst_34 = arith.constant 0.000000e+00 : f32
    %83 = vector.shape_cast %82 : vector<16x1xi1> to vector<16x1xi1>
    %84 = vector.broadcast %83 : vector<16x1xi1> to vector<16x32xi1>
    %85 = vector.broadcast %cst_34 : f32 to vector<16x32xf32>
    %86 = arith.select %84, %80, %85 : vector<16x32xi1>, vector<16x32xf32>
    %87 = arith.maximumf %70, %86 : vector<16x32xf32>
    %c5 = arith.constant 5 : index
    %c0_35 = arith.constant 0 : index
    %c0_36 = arith.constant 0 : index
    %88 = vector.load %arg1[%c5, %c0_35, %c0_36] : memref<11x16x32xbf16, #tpu.memory_space<vmem>>, vector<1x16x32xbf16>
    %89 = vector.shape_cast %88 : vector<1x16x32xbf16> to vector<16x32xbf16>
    %cst_37 = arith.constant dense<0.000000e+00> : vector<16x32xf32>
    %90 = tpu.matmul %89, %1, %cst_37 {dimension_numbers = #tpu.dot_dimension_numbers<[1], [0], [0], [1], [0, 0, 1, 1], [], []>} : vector<16x32xbf16>, vector<32x32xbf16>, vector<16x32xf32> -> vector<16x32xf32>
    %91 = vector.broadcast %2 : vector<1x32xf32> to vector<16x32xf32>
    %92 = arith.addf %90, %91 : vector<16x32xf32>
    %cst_38 = arith.constant 0.000000e+00 : f32
    %93 = vector.broadcast %cst_38 : f32 to vector<16x32xf32>
    %94 = arith.cmpf oge, %92, %93 : vector<16x32xf32>
    %cst_39 = arith.constant 0.00999999977 : f32
    %95 = vector.broadcast %cst_39 : f32 to vector<16x32xf32>
    %96 = arith.mulf %95, %92 : vector<16x32xf32>
    %97 = arith.select %94, %92, %96 : vector<16x32xi1>, vector<16x32xf32>
    %c5_i32 = arith.constant 5 : i32
    %98 = vector.broadcast %c5_i32 : i32 to vector<16x1xi32>
    %99 = arith.cmpi sgt, %3, %98 : vector<16x1xi32>
    %cst_40 = arith.constant 0.000000e+00 : f32
    %100 = vector.shape_cast %99 : vector<16x1xi1> to vector<16x1xi1>
    %101 = vector.broadcast %100 : vector<16x1xi1> to vector<16x32xi1>
    %102 = vector.broadcast %cst_40 : f32 to vector<16x32xf32>
    %103 = arith.select %101, %97, %102 : vector<16x32xi1>, vector<16x32xf32>
    %104 = arith.maximumf %87, %103 : vector<16x32xf32>
    %c6 = arith.constant 6 : index
    %c0_41 = arith.constant 0 : index
    %c0_42 = arith.constant 0 : index
    %105 = vector.load %arg1[%c6, %c0_41, %c0_42] : memref<11x16x32xbf16, #tpu.memory_space<vmem>>, vector<1x16x32xbf16>
    %106 = vector.shape_cast %105 : vector<1x16x32xbf16> to vector<16x32xbf16>
    %cst_43 = arith.constant dense<0.000000e+00> : vector<16x32xf32>
    %107 = tpu.matmul %106, %1, %cst_43 {dimension_numbers = #tpu.dot_dimension_numbers<[1], [0], [0], [1], [0, 0, 1, 1], [], []>} : vector<16x32xbf16>, vector<32x32xbf16>, vector<16x32xf32> -> vector<16x32xf32>
    %108 = vector.broadcast %2 : vector<1x32xf32> to vector<16x32xf32>
    %109 = arith.addf %107, %108 : vector<16x32xf32>
    %cst_44 = arith.constant 0.000000e+00 : f32
    %110 = vector.broadcast %cst_44 : f32 to vector<16x32xf32>
    %111 = arith.cmpf oge, %109, %110 : vector<16x32xf32>
    %cst_45 = arith.constant 0.00999999977 : f32
    %112 = vector.broadcast %cst_45 : f32 to vector<16x32xf32>
    %113 = arith.mulf %112, %109 : vector<16x32xf32>
    %114 = arith.select %111, %109, %113 : vector<16x32xi1>, vector<16x32xf32>
    %c6_i32 = arith.constant 6 : i32
    %115 = vector.broadcast %c6_i32 : i32 to vector<16x1xi32>
    %116 = arith.cmpi sgt, %3, %115 : vector<16x1xi32>
    %cst_46 = arith.constant 0.000000e+00 : f32
    %117 = vector.shape_cast %116 : vector<16x1xi1> to vector<16x1xi1>
    %118 = vector.broadcast %117 : vector<16x1xi1> to vector<16x32xi1>
    %119 = vector.broadcast %cst_46 : f32 to vector<16x32xf32>
    %120 = arith.select %118, %114, %119 : vector<16x32xi1>, vector<16x32xf32>
    %121 = arith.maximumf %104, %120 : vector<16x32xf32>
    %c7 = arith.constant 7 : index
    %c0_47 = arith.constant 0 : index
    %c0_48 = arith.constant 0 : index
    %122 = vector.load %arg1[%c7, %c0_47, %c0_48] : memref<11x16x32xbf16, #tpu.memory_space<vmem>>, vector<1x16x32xbf16>
    %123 = vector.shape_cast %122 : vector<1x16x32xbf16> to vector<16x32xbf16>
    %cst_49 = arith.constant dense<0.000000e+00> : vector<16x32xf32>
    %124 = tpu.matmul %123, %1, %cst_49 {dimension_numbers = #tpu.dot_dimension_numbers<[1], [0], [0], [1], [0, 0, 1, 1], [], []>} : vector<16x32xbf16>, vector<32x32xbf16>, vector<16x32xf32> -> vector<16x32xf32>
    %125 = vector.broadcast %2 : vector<1x32xf32> to vector<16x32xf32>
    %126 = arith.addf %124, %125 : vector<16x32xf32>
    %cst_50 = arith.constant 0.000000e+00 : f32
    %127 = vector.broadcast %cst_50 : f32 to vector<16x32xf32>
    %128 = arith.cmpf oge, %126, %127 : vector<16x32xf32>
    %cst_51 = arith.constant 0.00999999977 : f32
    %129 = vector.broadcast %cst_51 : f32 to vector<16x32xf32>
    %130 = arith.mulf %129, %126 : vector<16x32xf32>
    %131 = arith.select %128, %126, %130 : vector<16x32xi1>, vector<16x32xf32>
    %c7_i32 = arith.constant 7 : i32
    %132 = vector.broadcast %c7_i32 : i32 to vector<16x1xi32>
    %133 = arith.cmpi sgt, %3, %132 : vector<16x1xi32>
    %cst_52 = arith.constant 0.000000e+00 : f32
    %134 = vector.shape_cast %133 : vector<16x1xi1> to vector<16x1xi1>
    %135 = vector.broadcast %134 : vector<16x1xi1> to vector<16x32xi1>
    %136 = vector.broadcast %cst_52 : f32 to vector<16x32xf32>
    %137 = arith.select %135, %131, %136 : vector<16x32xi1>, vector<16x32xf32>
    %138 = arith.maximumf %121, %137 : vector<16x32xf32>
    %c8 = arith.constant 8 : index
    %c0_53 = arith.constant 0 : index
    %c0_54 = arith.constant 0 : index
    %139 = vector.load %arg1[%c8, %c0_53, %c0_54] : memref<11x16x32xbf16, #tpu.memory_space<vmem>>, vector<1x16x32xbf16>
    %140 = vector.shape_cast %139 : vector<1x16x32xbf16> to vector<16x32xbf16>
    %cst_55 = arith.constant dense<0.000000e+00> : vector<16x32xf32>
    %141 = tpu.matmul %140, %1, %cst_55 {dimension_numbers = #tpu.dot_dimension_numbers<[1], [0], [0], [1], [0, 0, 1, 1], [], []>} : vector<16x32xbf16>, vector<32x32xbf16>, vector<16x32xf32> -> vector<16x32xf32>
    %142 = vector.broadcast %2 : vector<1x32xf32> to vector<16x32xf32>
    %143 = arith.addf %141, %142 : vector<16x32xf32>
    %cst_56 = arith.constant 0.000000e+00 : f32
    %144 = vector.broadcast %cst_56 : f32 to vector<16x32xf32>
    %145 = arith.cmpf oge, %143, %144 : vector<16x32xf32>
    %cst_57 = arith.constant 0.00999999977 : f32
    %146 = vector.broadcast %cst_57 : f32 to vector<16x32xf32>
    %147 = arith.mulf %146, %143 : vector<16x32xf32>
    %148 = arith.select %145, %143, %147 : vector<16x32xi1>, vector<16x32xf32>
    %c8_i32 = arith.constant 8 : i32
    %149 = vector.broadcast %c8_i32 : i32 to vector<16x1xi32>
    %150 = arith.cmpi sgt, %3, %149 : vector<16x1xi32>
    %cst_58 = arith.constant 0.000000e+00 : f32
    %151 = vector.shape_cast %150 : vector<16x1xi1> to vector<16x1xi1>
    %152 = vector.broadcast %151 : vector<16x1xi1> to vector<16x32xi1>
    %153 = vector.broadcast %cst_58 : f32 to vector<16x32xf32>
    %154 = arith.select %152, %148, %153 : vector<16x32xi1>, vector<16x32xf32>
    %155 = arith.maximumf %138, %154 : vector<16x32xf32>
    %c9 = arith.constant 9 : index
    %c0_59 = arith.constant 0 : index
    %c0_60 = arith.constant 0 : index
    %156 = vector.load %arg1[%c9, %c0_59, %c0_60] : memref<11x16x32xbf16, #tpu.memory_space<vmem>>, vector<1x16x32xbf16>
    %157 = vector.shape_cast %156 : vector<1x16x32xbf16> to vector<16x32xbf16>
    %cst_61 = arith.constant dense<0.000000e+00> : vector<16x32xf32>
    %158 = tpu.matmul %157, %1, %cst_61 {dimension_numbers = #tpu.dot_dimension_numbers<[1], [0], [0], [1], [0, 0, 1, 1], [], []>} : vector<16x32xbf16>, vector<32x32xbf16>, vector<16x32xf32> -> vector<16x32xf32>
    %159 = vector.broadcast %2 : vector<1x32xf32> to vector<16x32xf32>
    %160 = arith.addf %158, %159 : vector<16x32xf32>
    %cst_62 = arith.constant 0.000000e+00 : f32
    %161 = vector.broadcast %cst_62 : f32 to vector<16x32xf32>
    %162 = arith.cmpf oge, %160, %161 : vector<16x32xf32>
    %cst_63 = arith.constant 0.00999999977 : f32
    %163 = vector.broadcast %cst_63 : f32 to vector<16x32xf32>
    %164 = arith.mulf %163, %160 : vector<16x32xf32>
    %165 = arith.select %162, %160, %164 : vector<16x32xi1>, vector<16x32xf32>
    %c9_i32 = arith.constant 9 : i32
    %166 = vector.broadcast %c9_i32 : i32 to vector<16x1xi32>
    %167 = arith.cmpi sgt, %3, %166 : vector<16x1xi32>
    %cst_64 = arith.constant 0.000000e+00 : f32
    %168 = vector.shape_cast %167 : vector<16x1xi1> to vector<16x1xi1>
    %169 = vector.broadcast %168 : vector<16x1xi1> to vector<16x32xi1>
    %170 = vector.broadcast %cst_64 : f32 to vector<16x32xf32>
    %171 = arith.select %169, %165, %170 : vector<16x32xi1>, vector<16x32xf32>
    %172 = arith.maximumf %155, %171 : vector<16x32xf32>
    %c10 = arith.constant 10 : index
    %c0_65 = arith.constant 0 : index
    %c0_66 = arith.constant 0 : index
    %173 = vector.load %arg1[%c10, %c0_65, %c0_66] : memref<11x16x32xbf16, #tpu.memory_space<vmem>>, vector<1x16x32xbf16>
    %174 = vector.shape_cast %173 : vector<1x16x32xbf16> to vector<16x32xbf16>
    %cst_67 = arith.constant dense<0.000000e+00> : vector<16x32xf32>
    %175 = tpu.matmul %174, %1, %cst_67 {dimension_numbers = #tpu.dot_dimension_numbers<[1], [0], [0], [1], [0, 0, 1, 1], [], []>} : vector<16x32xbf16>, vector<32x32xbf16>, vector<16x32xf32> -> vector<16x32xf32>
    %176 = vector.broadcast %2 : vector<1x32xf32> to vector<16x32xf32>
    %177 = arith.addf %175, %176 : vector<16x32xf32>
    %cst_68 = arith.constant 0.000000e+00 : f32
    %178 = vector.broadcast %cst_68 : f32 to vector<16x32xf32>
    %179 = arith.cmpf oge, %177, %178 : vector<16x32xf32>
    %cst_69 = arith.constant 0.00999999977 : f32
    %180 = vector.broadcast %cst_69 : f32 to vector<16x32xf32>
    %181 = arith.mulf %180, %177 : vector<16x32xf32>
    %182 = arith.select %179, %177, %181 : vector<16x32xi1>, vector<16x32xf32>
    %c10_i32 = arith.constant 10 : i32
    %183 = vector.broadcast %c10_i32 : i32 to vector<16x1xi32>
    %184 = arith.cmpi sgt, %3, %183 : vector<16x1xi32>
    %cst_70 = arith.constant 0.000000e+00 : f32
    %185 = vector.shape_cast %184 : vector<16x1xi1> to vector<16x1xi1>
    %186 = vector.broadcast %185 : vector<16x1xi1> to vector<16x32xi1>
    %187 = vector.broadcast %cst_70 : f32 to vector<16x32xf32>
    %188 = arith.select %186, %182, %187 : vector<16x32xi1>, vector<16x32xf32>
    %189 = arith.maximumf %172, %188 : vector<16x32xf32>
    %c0_71 = arith.constant 0 : index
    %c0_72 = arith.constant 0 : index
    %190 = vector.load %arg5[%c0_71, %c0_72] : memref<16x32xf32, #tpu.memory_space<vmem>>, vector<16x32xf32>
    tpu.vector_store %arg5[%c0_71, %c0_72], %189 {strides = array<i32>} : memref<16x32xf32, #tpu.memory_space<vmem>>, vector<16x32xf32>,
    return
  }
  func.func @transform_0(%arg0: i32) -> (i32, i32, i32) {
    %c0_i32 = arith.constant 0 : i32
    %c0_i32_0 = arith.constant 0 : i32
    %c0_i32_1 = arith.constant 0 : i32
    return %c0_i32, %arg0, %c0_i32_0 : i32, i32, i32
  }
  func.func @transform_1(%arg0: i32) -> (i32, i32) {
    %c0_i32 = arith.constant 0 : i32
    %c0_i32_0 = arith.constant 0 : i32
    %c0_i32_1 = arith.constant 0 : i32
    return %c0_i32, %c0_i32_0 : i32, i32
  }
  func.func @transform_2(%arg0: i32) -> (i32, i32) {
    %c0_i32 = arith.constant 0 : i32
    %c0_i32_0 = arith.constant 0 : i32
    %c0_i32_1 = arith.constant 0 : i32
    return %c0_i32, %c0_i32_0 : i32, i32
  }
  func.func @transform_3(%arg0: i32) -> (i32, i32) {
    %c0_i32 = arith.constant 0 : i32
    %c0_i32_0 = arith.constant 0 : i32
    return %arg0, %c0_i32 : i32, i32
  }
  func.func @transform_4(%arg0: i32) -> (i32, i32) {
    %c0_i32 = arith.constant 0 : i32
    %c0_i32_0 = arith.constant 0 : i32
    return %arg0, %c0_i32 : i32, i32
  }
}

</mosaic_0001>

<bundles_post_ra>
// kernel: tpu_custom_call.1
= control target key start
LH: loop header
LB: loop body
LE: loop exit
PB: predicated region body
PF: predicated region fallthrough
CT: control target
= control target key end

     0   :  { %9 = vsyncpa [#allocation3], 0  ;;  %s1462_s0 = inlined_call_operand.hbm [shape: bf16[11,32,32], index: 0, kind: input, shape index: {}]   ;;  %s1463_s1 = inlined_call_operand.vmem [shape: f32[32,32], index: 1, kind: input, shape index: {}]   ;;  %s1464_s2 = inlined_call_operand.vmem [shape: f32[1,32], index: 2, kind: input, shape index: {}]   ;;  %s1465_s3 = inlined_call_operand.vmem [shape: s32[32,1], index: 3, kind: input, shape index: {}]   ;;  %s1466_s4 = inlined_call_operand.hbm [shape: f32[32,32], index: 4, kind: output, shape index: {}]  }
   0x1   :  { %11 = vsyncpa [#allocation3 + $0x1], 0 }
   0x2   :  { %12 = vsyncpa [#allocation4], 0 }
   0x3   :  { %14 = vsyncpa [#allocation4 + $0x1], 0  ;;  %s1167_s15 = smov 0   ;;  %s1169_s16 = smov 0  }
   0x4   :  { %s1171_s17 = smov 0   ;;  %s1173_s18 = smov 0  }
   0x5 LB: > { %s1188_s19 = sadd.s32 4294967295, %s1131_s18   ;;  %s898_s20 = sadd.s32 4294967294, %s1131_s18   ;;  %s1131_s18 = sphi %s1173_s18, %s1474_s18   ;;  %s1127_s17 = sphi %s1171_s17, %s1473_s17   ;;  %s1123_s16 = sphi %s1169_s16, %s1472_s16   ;;  %s1119_s15 = sphi %s1167_s15, %s1471_s15  }
   0x6   : > { %s1192_s21 = sadd.s32 1, %s1131_s18   ;;  %s27_s22 = sadd.s32 1, %s1127_s17 }
   0x7   : > { %s24_s23 = ssub.s32 %s1131_s18, %s1192_s21  ;;  %p34_p0 = scmp.ne.s32.totalorder %s1127_s17, %s1123_s16 }
   0x8   : > { %p25_p1 = scmp.eq.s32.totalorder %s24_s23, 0  ;;  %p35_p2 = scmp.eq.s32.totalorder %s1131_s18, 0 }
   0x9   : > { %p40_p3 = scmp.ne.s32.totalorder %s1123_s16, %s1119_s15  ;;  %p41_p4 = scmp.eq.s32.totalorder %s1188_s19, 0 }
   0xa   : > { %s1204_s24 = scalar_select %p25_p1, %s1127_s17, %s27_s22  }
   0xb   : > { %p1206_p5 = por %p35_p2, %p34_p0  ;;  %p1210_p6 = por %p41_p4, %p40_p3 }
   0xc   : > { %p132_p7 = scmp.eq.s32.totalorder %s1188_s19, 1  ;;  %p138_p8 = scmp.eq.s32.totalorder %s898_s20, 1 }
   0xd   : > { %p900_p11 = scmp.ge.s32.totalorder %s1131_s18, 2 }
   0xe   : > { %p1215_p9 = por %p132_p7, %p34_p0  ;;  %p1219_p10 = por %p138_p8, %p40_p3 }
   0xf   : > { %160 = sbr.rel (%p900_p11) target bundleno = 34 (0x22), region = 24 }
  0x14   : > { %s164_s29 = sand.u32 1, %s1127_s17   ;;  %s989_s30 = sshll.u32 %s1131_s18, 3 }
  0x15   : > { %s1002_s5 = smul.u32 88, %s164_s29  ;;  %s173_s8 = scalar_lea.hbm %s1462_s0, %s989_s30 }
  0x16   : > { %s186_s9 = sshll.u32 %s173_s8, 4  ;;  %s1133_s14 = smov 256   ;;  %s187_s9 = int_to_ptr.hbm [resolvable:$true] %s186_s9 }
  0x17   : > { %s1004_s10 = scalar_select %p1206_p5, [#allocation0], [#allocation8] }
  0x18   : > { %s168_s11 = scalar_lea.vmem [#allocation2], %s1002_s5  ;;  %1005 = sst [smem:[#allocation7]] (%p1206_p5), %s1133_s14 }
  0x19   : > { %s188_s12 = sshll.u32 %s168_s11, 4  ;;  %s178_s13 = sld [smem:[%s1004_s10]]   ;;  %s189_s12 = int_to_ptr.vmem [resolvable:$true] %s188_s12 }
  0x1a   : > { %s1134_s20 = smov 128   ;;  %s1135_s22 = smov 2  }
  0x1b   : > { %1006 = sst [smem:[#allocation7 + $0x1]] (%p1206_p5), %s1134_s20  ;;  %s1136_s23 = smov 64  }
  0x1c   : > { %1007 = sst [smem:[#allocation7 + $0x2]] (%p1206_p5), %s1135_s22  ;;  %s1137_s5 = smov 4  }
  0x1d   : > { %1008 = sst [smem:[#allocation7 + $0x3]] (%p1206_p5), %s1136_s23  ;;  %s165_s7 = scalar_lea.sflag [#allocation3], %s164_s29 }
  0x1e   : > { %1009 = sst [smem:[#allocation7 + $0x4]] (%p1206_p5), %s1136_s23  ;;  %s1138_s8 = smov [#allocation6]  }
  0x1f   : > { %s903_s30 = sshll.u32 %s178_s13, 26  ;;  %1010 = sst [smem:[#allocation7 + $0x5]] (%p1206_p5), %s1137_s5 }
  0x20   : > { %s904_s6 = sadd.s32 134217728, %s903_s30 }
  0x21   : > { %1011 = dma.general (%p1206_p5), %s187_s9, 1408, %s189_s12, %s165_s7, %s1138_s8, [#allocation7], %s904_s6, 0  }
  0x22 PF: > { %p905_p12 = scmp.ge.s32.totalorder %s1131_s18, 1  ;;  %p218_p13 = scmp.lt.s32.totalorder %s1131_s18, 3 }
  0x24   : > { %p219_p0 = pnand %p905_p12, %p218_p13 }
  0x25   : > { %s1250_s10 = sand.u32 (!%p219_p0), 1, %s1123_s16  }
  0x26   : > { %222 = sbr.rel (%p219_p0) target bundleno = 240 (0xf0), region = 36  ;;  %s225_s13 = scalar_lea.sflag (!%p219_p0), [#allocation3], %s1250_s10 }
  0x27   : > { %s1003_s11 = smul.u32 (!%p219_p0), 88, %s1250_s10 }
  0x29   : > { %s1254_s14 = scalar_lea.vmem (!%p219_p0), [#allocation2], %s1003_s11 }
  0x2b   : > { %1110 = dma.done.wait (%p1210_p6), %s225_s13, 1408  }
  0x2c   : > { %1112 = vsyncadd (%p1210_p6), %s225_s13, 4294965888  ;;  %s907_s25 = sshll.u32 %s1188_s19, 1  ;;  %v1139_v0 = vmov 0   ;;  %v270_v2 = vld [vmem:[%s1463_s1 + $0x10] sm:$0xff]  ;;  %v271_v3 = vld [vmem:[%s1463_s1 + $0x18] sm:$0xff]  ;;  %vm287_vm5 = vcmask 261120  }
  0x2d   : > { %1063 = vset.pattern.permute.xlu2 %v1139_v0  ;;  %1062 = vset.pattern.permute.xlu1 %v1139_v0  ;;  %p261_p1 = scmp.lt.s32.totalorder %s907_s25, 3  ;;  %v273_v4 = vpack.c.bf16 %v271_v3, %v270_v2  ;;  %v268_v5 = vld [vmem:[%s1463_s1] sm:$0xff]  ;;  %v269_v6 = vld [vmem:[%s1463_s1 + $0x8] sm:$0xff]  ;;  %v993_v16 = vld [vmem:[%s1254_s14 + $0x18] sm:$0xff]  ;;  %s798_s22 = scalar_lea.sflag [#allocation4], %s1250_s10 }
  0x2e   : > { %1061 = vset.pattern.permute.xlu0 %v1139_v0  ;;  %v272_v11 = vpack.c.bf16 %v269_v6, %v268_v5  ;;  %v990_v12 = vld [vmem:[%s1254_s14] sm:$0xff]  ;;  %v991_v13 = vld [vmem:[%s1254_s14 + $0x8] sm:$0xff]  ;;  %v992_v14 = vld [vmem:[%s1254_s14 + $0x10] sm:$0xff]  ;;  %s1085_s7 = scalar_lea.hbm %s1466_s4, 32 }
  0x2f   : > { %s1476_s25 = smov (!%p261_p1, %s907_s25), 3  ;;  %297 = vmatpush.bf16.msra.mxu0 %v273_v4  ;;  %342 = vmatpush.bf16.msra.mxu1 %v273_v4  ;;  %v994_v22 = vld [vmem:[%s1254_s14 + $0x20] sm:$0xff]  ;;  %v995_v23 = vld [vmem:[%s1254_s14 + $0x28] sm:$0xff]  ;;  %v996_v24 = vld [vmem:[%s1254_s14 + $0x30] sm:$0xff] }
  0x30   : > { %s908_s29 = sshll.u32 %s1476_s25, 3  ;;  %389 = vmatpush.bf16.msra.mxu2 %v273_v4  ;;  %436 = vmatpush.bf16.msra.mxu3 %v273_v4  ;;  %v997_v26 = vld [vmem:[%s1254_s14 + $0x38] sm:$0xff]  ;;  %v998_v32 = vld [vmem:[%s1254_s14 + $0x40] sm:$0xff]  ;;  %v999_v33 = vld [vmem:[%s1254_s14 + $0x48] sm:$0xff]  ;;  %s1001_s25 = sshll.u32 %s1188_s19, 4 }
  0x31   : > { %s264_s20 = scalar_lea.vmem %s1465_s3, %s908_s29  ;;  %v1000_v34 = vld [vmem:[%s1254_s14 + $0x50] sm:$0xff]  ;;  %v1362_v50 = vld [vmem:[%s1464_s2] ss:$0 sm:$0xff]  ;;  %s906_s14 = sshll.u32 %s1250_s10, 4 }
  0x32   : > { %v1267_v1 = vld [vmem:[%s264_s20] sm:$0xff]  ;;  %v1287_v10 = vld [vmem:[%s264_s20 + $0x8] sm:$0xff]  ;;  %s809_s12 = scalar_lea.hbm %s1466_s4, %s1001_s25  ;;  %s258_s20 = scalar_lea.vmem [#allocation5], %s906_s14 }
  0x33   : > { %vm403_vm0 = vcmp.gt.s32.totalorder %v1267_v1, 2  ;;  %vm356_vm1 = vcmp.gt.s32.totalorder %v1267_v1, 1  ;;  %vm311_vm2 = vcmp.gt.s32.totalorder %v1267_v1, 0  ;;  %vm404_vm3 = vcmp.gt.s32.totalorder %v1287_v10, 2  ;;  %298 = vmatpush.bf16.msra.mxu0 %v272_v11  ;;  %343 = vmatpush.bf16.msra.mxu1 %v272_v11  ;;  %s810_s19 = sshll.u32 %s258_s20, 4  ;;  %s812_s26 = sshll.u32 %s809_s12, 4  ;;  %s811_s19 = int_to_ptr.vmem [resolvable:$true] %s810_s19  ;;  %s813_s26 = int_to_ptr.hbm [resolvable:$true] %s812_s26 }
  0x34   : > { %v405_v7 = vsel %vm403_vm0, 1, %v1139_v0  ;;  %v358_v8 = vsel %vm356_vm1, 1, %v1139_v0  ;;  %v313_v9 = vsel %vm311_vm2, 1, %v1139_v0  ;;  %vm357_vm4 = vcmp.gt.s32.totalorder %v1287_v10, 1  ;;  %390 = vmatpush.bf16.msra.mxu2 %v272_v11  ;;  %437 = vmatpush.bf16.msra.mxu3 %v272_v11  ;;  %s1079_s23 = sshra.s32 %s813_s26, 4  ;;  %s1080_s23 = int_to_ptr.hbm [resolvable:$true] %s1079_s23 }
  0x35   : > { %408 = vperm.xlu2 %1063, %v405_v7   ;;  %361 = vperm.xlu1 %1062, %v358_v8   ;;  %v406_v15 = vsel %vm404_vm3, 1, %v1139_v0  ;;  %vm312_vm6 = vcmp.gt.s32.totalorder %v1287_v10, 0  ;;  %v359_v17 = vsel %vm357_vm4, 1, %v1139_v0  ;;  %vm497_vm7 = vcmp.gt.s32.totalorder %v1267_v1, 4  ;;  %s1081_s30 = scalar_lea.hbm %s1080_s23, 16  ;;  %p1086_p5 = scmp.lt.s32.totalorder %s1080_s23, %s1466_s4 }
  0x36   : > { %316 = vperm.xlu0 %1061, %v313_v9   ;;  %913 = vmatmul.msk.bf16.vlgmr.msra.gmra.mxu0 %vm287_vm5, %v990_v12  ;;  %v314_v18 = vsel %vm312_vm6, 1, %v1139_v0  ;;  %vm451_vm8 = vcmp.gt.s32.totalorder %v1287_v10, 3  ;;  %v499_v19 = vsel %vm497_vm7, 1, %v1139_v0  ;;  %vm450_vm9 = vcmp.gt.s32.totalorder %v1267_v1, 3  ;;  %p1082_p2 = scmp.ne.s32.totalorder %s1080_s23, %s1081_s30  ;;  %p1087_p6 = scmp.lt.s32.totalorder %s1085_s7, %s1081_s30 }
  0x37   : > { %920 = vmatmul.msk.bf16.vlgmr.msra.gmra.mxu1 %vm287_vm5, %v991_v13  ;;  %927 = vmatmul.msk.bf16.vlgmr.msra.gmra.mxu2 %vm287_vm5, %v992_v14  ;;  %v453_v20 = vsel %vm451_vm8, 1, %v1139_v0  ;;  %v452_v21 = vsel %vm450_vm9, 1, %v1139_v0  ;;  %vm545_vm10 = vcmp.gt.s32.totalorder %v1287_v10, 5  ;;  %vm544_vm11 = vcmp.gt.s32.totalorder %v1267_v1, 5 }
  0x38   : > { %577 = vmatpush.bf16.msrb.mxu2 %v273_v4  ;;  %934 = vmatmul.msk.bf16.vlgmr.msra.gmra.mxu3 %vm287_vm5, %v993_v16  ;;  %v547_v25 = vsel %vm545_vm10, 1, %v1139_v0  ;;  %vm498_vm12 = vcmp.gt.s32.totalorder %v1287_v10, 4  ;;  %v546_v27 = vsel %vm544_vm11, 1, %v1139_v0  ;;  %vm638_vm13 = vcmp.gt.s32.totalorder %v1267_v1, 7  ;;  %p1083_p3 = pnand %p1082_p2, %p1215_p9  ;;  %p1088_p7 = por %p1087_p6, %p1086_p5 }
  0x39   : > { %483 = vmatpush.bf16.msrb.mxu0 %v273_v4  ;;  %530 = vmatpush.bf16.msrb.mxu1 %v273_v4  ;;  %v500_v28 = vsel %vm498_vm12, 1, %v1139_v0  ;;  %vm592_vm14 = vcmp.gt.s32.totalorder %v1287_v10, 6  ;;  %v640_v29 = vsel %vm638_vm13, 1, %v1139_v0  ;;  %vm591_vm15 = vcmp.gt.s32.totalorder %v1267_v1, 6 }
  0x3a   : > { %624 = vmatpush.bf16.msrb.mxu3 %v273_v4  ;;  %v594_v30 = vsel %vm592_vm14, 1, %v1139_v0  ;;  %v593_v31 = vsel %vm591_vm15, 1, %v1139_v0  ;;  %vm686_vm0 = vcmp.gt.s32.totalorder %v1287_v10, 8  ;;  %vm685_vm1 = vcmp.gt.s32.totalorder %v1267_v1, 8  ;;  %p1084_p4 = pneg %p1083_p3 }
  0x3b   : > { %v688_v35 = vsel %vm686_vm0, 1, %v1139_v0  ;;  %vm639_vm2 = vcmp.gt.s32.totalorder %v1287_v10, 7  ;;  %v687_v36 = vsel %vm685_vm1, 1, %v1139_v0  ;;  %vm779_vm3 = vcmp.gt.s32.totalorder %v1267_v1, 10 }
  0x3c   : > { %578 = vmatpush.bf16.msrb.mxu2 %v272_v11  ;;  %v641_v37 = vsel %vm639_vm2, 1, %v1139_v0  ;;  %vm733_vm4 = vcmp.gt.s32.totalorder %v1287_v10, 9  ;;  %v781_v38 = vsel %vm779_vm3, 1, %v1139_v0  ;;  %vm732_vm6 = vcmp.gt.s32.totalorder %v1267_v1, 9  ;;  %p1089_p8 = pnand %p1088_p7, %p1084_p4 }
  0x3d   : > { %411 = vperm.xlu2 %1063, %v406_v15   ;;  %364 = vperm.xlu1 %1062, %v359_v17   ;;  %v735_v39 = vsel %vm733_vm4, 1, %v1139_v0  ;;  %v734_v40 = vsel %vm732_vm6, 1, %v1139_v0  ;;  %vm780_vm7 = vcmp.gt.s32.totalorder %v1287_v10, 10 }
  0x3e   : > { %319 = vperm.xlu0 %1061, %v314_v18   ;;  %484 = vmatpush.bf16.msrb.mxu0 %v272_v11  ;;  %v782_v41 = vsel %vm780_vm7, 1, %v1139_v0 }
  0x3f   : > { %531 = vmatpush.bf16.msrb.mxu1 %v272_v11  ;;  %625 = vmatpush.bf16.msrb.mxu3 %v272_v11 }
  0x40   : > { %765 = vmatpush.bf16.msra.mxu2 %v273_v4 }
  0x42   : > { %671 = vmatpush.bf16.msra.mxu0 %v273_v4 }
  0x43   : > { %718 = vmatpush.bf16.msra.mxu1 %v273_v4 }
  0x44   : > { %766 = vmatpush.bf16.msra.mxu2 %v272_v11 }
  0x45   : > { %502 = vperm.xlu2 %1063, %v499_v19   ;;  %458 = vperm.xlu1 %1062, %v453_v20  }
  0x46   : > { %455 = vperm.xlu0 %1061, %v452_v21   ;;  %672 = vmatpush.bf16.msra.mxu0 %v272_v11 }
  0x47   : > { %719 = vmatpush.bf16.msra.mxu1 %v272_v11  ;;  %941 = vmatmul.msk.bf16.vlgmr.msrb.gmra.mxu0 %vm287_vm5, %v994_v22 }
  0x48   : > { %948 = vmatmul.msk.bf16.vlgmr.msrb.gmra.mxu1 %vm287_vm5, %v995_v23  ;;  %955 = vmatmul.msk.bf16.vlgmr.msrb.gmra.mxu2 %vm287_vm5, %v996_v24 }
  0x49   : > { %962 = vmatmul.msk.bf16.vlgmr.msrb.gmra.mxu3 %vm287_vm5, %v997_v26 }
  0x4d   : > { %552 = vperm.xlu2 %1063, %v547_v25   ;;  %549 = vperm.xlu1 %1062, %v546_v27  }
  0x4e   : > { %505 = vperm.xlu0 %1061, %v500_v28  }
  0x55   : > { %643 = vperm.xlu2 %1063, %v640_v29   ;;  %599 = vperm.xlu1 %1062, %v594_v30  }
  0x56   : > { %596 = vperm.xlu0 %1061, %v593_v31  }
  0x57   : > { %969 = vmatmul.msk.bf16.vlgmr.msra.gmra.mxu0 %vm287_vm5, %v998_v32 }
  0x58   : > { %976 = vmatmul.msk.bf16.vlgmr.msra.gmra.mxu1 %vm287_vm5, %v999_v33  ;;  %983 = vmatmul.msk.bf16.vlgmr.msra.gmra.mxu2 %vm287_vm5, %v1000_v34 }
  0x5d   : > { %693 = vperm.xlu2 %1063, %v688_v35   ;;  %690 = vperm.xlu1 %1062, %v687_v36  }
  0x5e   : > { %646 = vperm.xlu0 %1061, %v641_v37  }
  0x65   : > { %784 = vperm.xlu2 %1063, %v781_v38   ;;  %740 = vperm.xlu1 %1062, %v735_v39  }
  0x66   : > { %737 = vperm.xlu0 %1061, %v734_v40  }
  0x6e   : > { %787 = vperm.xlu0 %1061, %v782_v41  }
  0x8f   : > { %v409_v42 = vpop.permute.xlu2 %408 }
  0x90   : > { %vm413_vm14 = vcmp.eq.s32.totalorder %v409_v42, 1 }
  0x97   : > { %v1349_v45 = vpop.permute.xlu2 %411 }
  0x98   : > { %vm414_vm3 = vcmp.eq.s32.totalorder %v1349_v45, 1 }
  0x9f   : > { %v1355_v48 = vpop.permute.xlu2 %502 }
  0xa0   : > { %vm507_vm4 = vcmp.eq.s32.totalorder %v1355_v48, 1 }
  0xa7   : > { %v362_v44 = vpop.permute.xlu1 %361  ;;  %v1371_v0 = vpop.permute.xlu2 %552 }
  0xa8   : > { %v317_v43 = vpop.permute.xlu0 %316  ;;  %vm366_vm11 = vcmp.eq.s32.totalorder %v362_v44, 1 }
  0xa9   : > { %vm321_vm12 = vcmp.eq.s32.totalorder %v317_v43, 1 }
  0xaf   : > { %v1353_v47 = vpop.permute.xlu1 %364  ;;  %v1381_v26 = vpop.permute.xlu2 %643 }
  0xb0   : > { %v1351_v46 = vpop.permute.xlu0 %319  ;;  %vm367_vm6 = vcmp.eq.s32.totalorder %v1353_v47, 1 }
  0xb3   : > { %v300_v51 = vpop.f32.mrf.mxu0 }
  0xb4   : > { %v345_v52 = vpop.f32.mrf.mxu1  ;;  %v301_v54 = vadd.f32 %v1362_v50, %v300_v51 }
  0xb5   : > { %v346_v55 = vadd.f32 %v1362_v50, %v345_v52 }
  0xb6   : > { %v307_v57 = vmul.f32 0.01, %v301_v54  ;;  %vm305_vm8 = vcmp.ge.f32.partialorder %v301_v54, 0.0 }
  0xb7   : > { %v1364_v53 = vpop.permute.xlu1 %458  ;;  %v352_v58 = vmul.f32 0.01, %v346_v55  ;;  %vm350_vm9 = vcmp.ge.f32.partialorder %v346_v55, 0.0  ;;  %v1403_v45 = vpop.permute.xlu2 %693 }
  0xb8   : > { %v1357_v49 = vpop.permute.xlu0 %455  ;;  %v309_v2 = vsel %vm305_vm8, %v301_v54, %v307_v57  ;;  %vm322_vm8 = vcmp.eq.s32.totalorder %v1351_v46, 1 }
  0xb9   : > { %v354_v3 = vsel %vm350_vm9, %v346_v55, %v352_v58  ;;  %v323_v8 = vsel %vm321_vm12, %v309_v2, 0.0  ;;  %vm460_vm7 = vcmp.eq.s32.totalorder %v1357_v49, 1  ;;  %vm461_vm9 = vcmp.eq.s32.totalorder %v1364_v53, 1 }
  0xba   : > { %v392_v56 = vpop.f32.mrf.mxu2  ;;  %v368_v9 = vsel %vm366_vm11, %v354_v3, 0.0 }
  0xbb   : > { %v393_v60 = vadd.f32 %v1362_v50, %v392_v56  ;;  %v439_v61 = vpop.f32.mrf.mxu3  ;;  %v302_v62 = vpop.f32.mrf.mxu0  ;;  %v370_v19 = vmax.f32 %v323_v8, %v368_v9 }
  0xbc   : > { %v347_v63 = vpop.f32.mrf.mxu1  ;;  %v440_v1 = vadd.f32 %v1362_v50, %v439_v61  ;;  %v303_v5 = vadd.f32 %v1362_v50, %v302_v62 }
  0xbd   : > { %v399_v4 = vmul.f32 0.01, %v393_v60  ;;  %vm397_vm10 = vcmp.ge.f32.partialorder %v393_v60, 0.0  ;;  %v348_v6 = vadd.f32 %v1362_v50, %v347_v63 }
  0xbe   : > { %v446_v10 = vmul.f32 0.01, %v440_v1  ;;  %vm444_vm13 = vcmp.ge.f32.partialorder %v440_v1, 0.0  ;;  %v308_v15 = vmul.f32 0.01, %v303_v5  ;;  %vm306_vm15 = vcmp.ge.f32.partialorder %v303_v5, 0.0 }
  0xbf   : > { %v1376_v7 = vpop.permute.xlu1 %549  ;;  %v401_v12 = vsel %vm397_vm10, %v393_v60, %v399_v4  ;;  %v353_v16 = vmul.f32 0.01, %v348_v6  ;;  %vm351_vm0 = vcmp.ge.f32.partialorder %v348_v6, 0.0 }
  0xc0   : > { %v1368_v59 = vpop.permute.xlu0 %505  ;;  %v415_v22 = vsel %vm413_vm14, %v401_v12, 0.0  ;;  %v448_v23 = vsel %vm444_vm13, %v440_v1, %v446_v10  ;;  %v310_v29 = vsel %vm306_vm15, %v303_v5, %v308_v15  ;;  %vm555_vm14 = vcmp.eq.s32.totalorder %v1371_v0, 1 }
  0xc1   : > { %v355_v30 = vsel %vm351_vm0, %v348_v6, %v353_v16  ;;  %v417_v31 = vmax.f32 %v370_v19, %v415_v22  ;;  %v462_v33 = vsel %vm460_vm7, %v448_v23, 0.0  ;;  %v324_v36 = vsel %vm322_vm8, %v310_v29, 0.0 }
  0xc2   : > { %v394_v11 = vpop.f32.mrf.mxu2  ;;  %v369_v37 = vsel %vm367_vm6, %v355_v30, 0.0  ;;  %vm554_vm15 = vcmp.eq.s32.totalorder %v1376_v7, 1  ;;  %vm648_vm6 = vcmp.eq.s32.totalorder %v1381_v26, 1 }
  0xc3   : > { %v395_v13 = vadd.f32 %v1362_v50, %v394_v11  ;;  %v441_v14 = vpop.f32.mrf.mxu3  ;;  %v464_v49 = vmax.f32 %v417_v31, %v462_v33  ;;  %v371_v54 = vmax.f32 %v324_v36, %v369_v37 }
  0xc4   : > { %v486_v17 = vpop.f32.mrf.mxu0  ;;  %v442_v25 = vadd.f32 %v1362_v50, %v441_v14 }
  0xc5   : > { %v533_v18 = vpop.f32.mrf.mxu1  ;;  %v487_v21 = vadd.f32 %v1362_v50, %v486_v17  ;;  %v400_v24 = vmul.f32 0.01, %v395_v13  ;;  %vm398_vm1 = vcmp.ge.f32.partialorder %v395_v13, 0.0 }
  0xc6   : > { %v534_v28 = vadd.f32 %v1362_v50, %v533_v18  ;;  %v447_v39 = vmul.f32 0.01, %v442_v25  ;;  %vm445_vm11 = vcmp.ge.f32.partialorder %v442_v25, 0.0 }
  0xc7   : > { %vm491_vm2 = vcmp.ge.f32.partialorder %v487_v21, 0.0  ;;  %v493_v27 = vmul.f32 0.01, %v487_v21  ;;  %v402_v34 = vsel %vm398_vm1, %v395_v13, %v400_v24  ;;  %v1390_v38 = vpop.permute.xlu1 %599 }
  0xc8   : > { %v597_v20 = vpop.permute.xlu0 %596  ;;  %v540_v40 = vmul.f32 0.01, %v534_v28  ;;  %vm538_vm10 = vcmp.ge.f32.partialorder %v534_v28, 0.0  ;;  %v416_v51 = vsel %vm414_vm3, %v402_v34, 0.0  ;;  %v449_v62 = vsel %vm445_vm11, %v442_v25, %v447_v39  ;;  %v785_v34 = vpop.permute.xlu2 %784 }
  0xc9   : > { %v495_v32 = vsel %vm491_vm2, %v487_v21, %v493_v27  ;;  %v418_v61 = vmax.f32 %v371_v54, %v416_v51  ;;  %vm601_vm0 = vcmp.eq.s32.totalorder %v597_v20, 1  ;;  %vm508_vm2 = vcmp.eq.s32.totalorder %v1368_v59, 1 }
  0xca   : > { %v509_v42 = vsel %vm507_vm4, %v495_v32, 0.0  ;;  %v542_v57 = vsel %vm538_vm10, %v534_v28, %v540_v40  ;;  %v463_v8 = vsel %vm461_vm9, %v449_v62, 0.0  ;;  %vm602_vm7 = vcmp.eq.s32.totalorder %v1390_v38, 1 }
  0xcb   : > { %v580_v35 = vpop.f32.mrf.mxu2  ;;  %v511_v56 = vmax.f32 %v464_v49, %v509_v42  ;;  %v556_v3 = vsel %vm554_vm15, %v542_v57, 0.0  ;;  %v465_v12 = vmax.f32 %v418_v61, %v463_v8 }
  0xcc   : > { %v627_v41 = vpop.f32.mrf.mxu3  ;;  %v581_v43 = vadd.f32 %v1362_v50, %v580_v35  ;;  %v488_v46 = vpop.f32.mrf.mxu0 }
  0xcd   : > { %v628_v44 = vadd.f32 %v1362_v50, %v627_v41  ;;  %v535_v47 = vpop.f32.mrf.mxu1  ;;  %v489_v52 = vadd.f32 %v1362_v50, %v488_v46  ;;  %v558_v9 = vmax.f32 %v511_v56, %v556_v3 }
  0xce   : > { %vm585_vm12 = vcmp.ge.f32.partialorder %v581_v43, 0.0  ;;  %v587_v55 = vmul.f32 0.01, %v581_v43  ;;  %v536_v48 = vadd.f32 %v1362_v50, %v535_v47 }
  0xcf   : > { %vm492_vm13 = vcmp.ge.f32.partialorder %v489_v52, 0.0  ;;  %v494_v60 = vmul.f32 0.01, %v489_v52  ;;  %v634_v1 = vmul.f32 0.01, %v628_v44  ;;  %vm632_vm1 = vcmp.ge.f32.partialorder %v628_v44, 0.0  ;;  %v691_v53 = vpop.permute.xlu1 %690 }
  0xd0   : > { %v1400_v58 = vpop.permute.xlu0 %646  ;;  %v589_v63 = vsel %vm585_vm12, %v581_v43, %v587_v55  ;;  %v541_v5 = vmul.f32 0.01, %v536_v48  ;;  %vm539_vm3 = vcmp.ge.f32.partialorder %v536_v48, 0.0  ;;  %vm695_vm10 = vcmp.eq.s32.totalorder %v691_v53, 1 }
  0xd1   : > { %v496_v2 = vsel %vm492_vm13, %v489_v52, %v494_v60  ;;  %v603_v4 = vsel %vm601_vm0, %v589_v63, 0.0  ;;  %v636_v13 = vsel %vm632_vm1, %v628_v44, %v634_v1  ;;  %vm649_vm15 = vcmp.eq.s32.totalorder %v1400_v58, 1 }
  0xd2   : > { %v510_v7 = vsel %vm508_vm2, %v496_v2, 0.0  ;;  %v605_v59 = vmax.f32 %v558_v9, %v603_v4  ;;  %v543_v19 = vsel %vm539_vm3, %v536_v48, %v541_v5  ;;  %v650_v24 = vsel %vm648_vm6, %v636_v13, 0.0 }
  0xd3   : > { %v582_v6 = vpop.f32.mrf.mxu2  ;;  %v512_v21 = vmax.f32 %v465_v12, %v510_v7  ;;  %v557_v30 = vsel %vm555_vm14, %v543_v19, 0.0  ;;  %vm789_vm14 = vcmp.eq.s32.totalorder %v785_v34, 1  ;;  %vm696_vm2 = vcmp.eq.s32.totalorder %v1403_v45, 1 }
  0xd4   : > { %v583_v10 = vadd.f32 %v1362_v50, %v582_v6  ;;  %v629_v11 = vpop.f32.mrf.mxu3  ;;  %v674_v15 = vpop.f32.mrf.mxu0  ;;  %v652_v28 = vmax.f32 %v605_v59, %v650_v24 }
  0xd5   : > { %v630_v14 = vadd.f32 %v1362_v50, %v629_v11  ;;  %v721_v16 = vpop.f32.mrf.mxu1  ;;  %v675_v18 = vadd.f32 %v1362_v50, %v674_v15  ;;  %v559_v35 = vmax.f32 %v512_v21, %v557_v30 }
  0xd6   : > { %vm586_vm4 = vcmp.ge.f32.partialorder %v583_v10, 0.0  ;;  %v588_v17 = vmul.f32 0.01, %v583_v10  ;;  %v722_v20 = vadd.f32 %v1362_v50, %v721_v16 }
  0xd7   : > { %vm679_vm8 = vcmp.ge.f32.partialorder %v675_v18, 0.0  ;;  %v681_v23 = vmul.f32 0.01, %v675_v18  ;;  %v635_v25 = vmul.f32 0.01, %v630_v14  ;;  %vm633_vm11 = vcmp.ge.f32.partialorder %v630_v14, 0.0  ;;  %v741_v60 = vpop.permute.xlu1 %740 }
  0xd8   : > { %v590_v22 = vsel %vm586_vm4, %v583_v10, %v588_v17  ;;  %vm726_vm9 = vcmp.ge.f32.partialorder %v722_v20, 0.0  ;;  %v728_v27 = vmul.f32 0.01, %v722_v20  ;;  %v738_v29 = vpop.permute.xlu0 %737  ;;  %vm743_vm3 = vcmp.eq.s32.totalorder %v741_v60, 1 }
  0xd9   : > { %v683_v26 = vsel %vm679_vm8, %v675_v18, %v681_v23  ;;  %v604_v31 = vsel %vm602_vm7, %v590_v22, 0.0  ;;  %vm742_vm12 = vcmp.eq.s32.totalorder %v738_v29, 1  ;;  %v637_v40 = vsel %vm633_vm11, %v630_v14, %v635_v25 }
  0xda   : > { %v697_v32 = vsel %vm695_vm10, %v683_v26, 0.0  ;;  %v730_v37 = vsel %vm726_vm9, %v722_v20, %v728_v27  ;;  %v606_v43 = vmax.f32 %v559_v35, %v604_v31  ;;  %v651_v52 = vsel %vm649_vm15, %v637_v40, 0.0 }
  0xdb   : > { %v768_v33 = vpop.f32.mrf.mxu2  ;;  %v699_v36 = vmax.f32 %v652_v28, %v697_v32  ;;  %v744_v44 = vsel %vm742_vm12, %v730_v37, 0.0 }
  0xdc   : > { %v769_v39 = vadd.f32 %v1362_v50, %v768_v33  ;;  %v676_v41 = vpop.f32.mrf.mxu0  ;;  %v653_v48 = vmax.f32 %v606_v43, %v651_v52 }
  0xdd   : > { %v723_v42 = vpop.f32.mrf.mxu1  ;;  %v677_v38 = vadd.f32 %v1362_v50, %v676_v41  ;;  %v746_v47 = vmax.f32 %v699_v36, %v744_v44 }
  0xde   : > { %vm773_vm13 = vcmp.ge.f32.partialorder %v769_v39, 0.0  ;;  %v775_v0 = vmul.f32 0.01, %v769_v39  ;;  %v724_v46 = vadd.f32 %v1362_v50, %v723_v42 }
  0xdf   : > { %vm680_vm0 = vcmp.ge.f32.partialorder %v677_v38, 0.0  ;;  %v682_v51 = vmul.f32 0.01, %v677_v38 }
  0xe0   : > { %v777_v49 = vsel %vm773_vm13, %v769_v39, %v775_v0  ;;  %vm727_vm1 = vcmp.ge.f32.partialorder %v724_v46, 0.0  ;;  %v729_v55 = vmul.f32 0.01, %v724_v46  ;;  %v788_v2 = vpop.permute.xlu0 %787 }
  0xe1   : > { %v791_v54 = vsel %vm789_vm14, %v777_v49, 0.0  ;;  %v684_v57 = vsel %vm680_vm0, %v677_v38, %v682_v51  ;;  %vm790_vm6 = vcmp.eq.s32.totalorder %v788_v2, 1 }
  0xe2   : > { %v793_v56 = vmax.f32 %v746_v47, %v791_v54  ;;  %v698_v61 = vsel %vm696_vm2, %v684_v57, 0.0  ;;  %v731_v63 = vsel %vm727_vm1, %v724_v46, %v729_v55 }
  0xe3   : > { %v770_v58 = vpop.f32.mrf.mxu2  ;;  %v700_v62 = vmax.f32 %v653_v48, %v698_v61  ;;  %v745_v3 = vsel %vm743_vm3, %v731_v63, 0.0 }
  0xe4   : > { %795 = vst.msk [vmem:[%s258_s20] sm:$0xff] %vm287_vm5, %v793_v56  ;;  %v771_v1 = vadd.f32 %v1362_v50, %v770_v58 }
  0xe5   : > { %v747_v4 = vmax.f32 %v700_v62, %v745_v3 }
  0xe6   : > { %vm774_vm4 = vcmp.ge.f32.partialorder %v771_v1, 0.0  ;;  %v776_v45 = vmul.f32 0.01, %v771_v1 }
  0xe8   : > { %v778_v5 = vsel %vm774_vm4, %v771_v1, %v776_v45 }
  0xe9   : > { %v792_v6 = vsel %vm790_vm6, %v778_v5, 0.0 }
  0xea   : > { %v794_v8 = vmax.f32 %v747_v4, %v792_v6 }
  0xec   : > { %796 = vst.msk [vmem:[%s258_s20 + $0x8] sm:$0xff] %vm287_vm5, %v794_v8 }
  0xed   : > { %1092 = shalt.err (!%p1089_p8)
}
  0xee   : > { %s1140_s10 = smov 128   ;;  %s1141_s13 = smov 8  }
  0xef   : > { %1013 = dma.vmem_to_hbm [thread:$0]  (%p1215_p9), %s811_s19, 256, %s813_s26, %s798_s22, %s1140_s10, %s1140_s10, %s1141_s13  }
  0xf0 PF: > { %s827_s14 = sand.u32 1, %s1119_s15   ;;  %p1016_p12 = pnand %p900_p11, %p1219_p10 }
  0xf1   : > { %s828_s25 = scalar_lea.sflag [#allocation4], %s827_s14 }
  0xf2   : > { %p1017_p13 = pneg %p1016_p12 }
  0xf4   : > { %1114 = dma.done.wait (%p1017_p13), %s828_s25, 256  }
  0xf5   : > { %1116 = vsyncadd (%p1017_p13), %s828_s25, 4294967040  ;;  %p17_p0 = scmp.ge.s32.totalorder %s1192_s21, 4   ;;  %s1471_s15 = smov %s1123_s16 }
  0xf6   : > { %s1472_s16 = smov %s1127_s17  ;;  %s1473_s17 = smov %s1204_s24 }
  0xf7   : > { %s1474_s18 = smov %s1192_s21  ;;  %19 = sbr.rel (!%p17_p0) target bundleno = 5 (0x5), region = 99 }
  0xfc   :  { %834 = vsyncpa [#allocation3], 1 }
  0xfd   :  { %836 = vsyncpa [#allocation3 + $0x1], 1 }
  0xfe   :  { %837 = vsyncpa [#allocation4], 1 }
  0xff   :  { %839 = vsyncpa [#allocation4 + $0x1], 1 }

</bundles_post_ra>
